<compile_context>
chip_gen: v6e
topology: v6e:2x2x1
jax: 0.10.0
libtpu: 0.0.40
codegen_flags: <defaults>
</compile_context>

<pallas_src>
import math
from functools import partial

import jax
import jax.numpy as jnp
from jax import lax
from jax.experimental import pallas as pl
from jax.experimental.pallas import tpu as pltpu


# --------------------------------------------------------------------------------------
# Kernel
# --------------------------------------------------------------------------------------
def _unpatch_kernel(x_ref, w_ref, b_ref, o_ref):
    """One (batch, channel-block, row-block) tile.

    x_ref: (C, rows_t, W)         input rows, NCHW native (batch dim squeezed)
    w_ref: (4, c_t, C)            folded weight, leading index k = 2*kh + kw
    b_ref: (c_t, 1)               bias (float32)
    o_ref: (c_t, 2*rows_t, 2*W)   output rows, NCHW native (batch dim squeezed)
    """
    rows_t = x_ref.shape[1]
    W = x_ref.shape[2]
    cdtype = w_ref.dtype

    # Lane "stretch" matrices: e0 routes column w -> 2w, e1 routes w -> 2w+1.
    # The MXU does the even/odd lane scatter (a relayout the VPU cannot express),
    # which is nearly free in this HBM-bound kernel.
    col = lax.broadcasted_iota(jnp.int32, (W, 2 * W), 1)
    row = lax.broadcasted_iota(jnp.int32, (W, 2 * W), 0)
    e0 = jnp.where(col == 2 * row, 1.0, 0.0).astype(cdtype)
    e1 = jnp.where(col == 2 * row + 1, 1.0, 0.0).astype(cdtype)

    # Hoist the resident operands out of the row loop.
    w00 = w_ref[0]                                   # tap (kh=0, kw=0): (c_t, C)
    w01 = w_ref[1]                                   # tap (kh=0, kw=1)
    w10 = w_ref[2]                                   # tap (kh=1, kw=0)
    w11 = w_ref[3]                                   # tap (kh=1, kw=1)
    bias = b_ref[...].astype(jnp.float32)            # (c_t, 1)

    def body(r, carry):
        x_r = x_ref[:, r, :].astype(cdtype)          # (C, W)
        for kh, (wa, wb) in ((0, (w00, w01)), (1, (w10, w11))):
            za = jnp.dot(wa, x_r, preferred_element_type=jnp.float32)   # (c_t, W)
            zb = jnp.dot(wb, x_r, preferred_element_type=jnp.float32)   # (c_t, W)
            y = (jnp.dot(za.astype(cdtype), e0, preferred_element_type=jnp.float32)
                 + jnp.dot(zb.astype(cdtype), e1, preferred_element_type=jnp.float32))
            y = y + bias                                                # (c_t, 2W)
            # Output row 2*(row_block_origin + r) + kh of the final NCHW tensor.
            o_ref[:, 2 * r + kh, :] = y.astype(o_ref.dtype)
        return carry

    lax.fori_loop(0, rows_t, body, 0)


# --------------------------------------------------------------------------------------
# Tiling / spec helpers
# --------------------------------------------------------------------------------------
def _maybe_single_buffered(block_shape, index_map, use_single):
    """BlockSpec requesting single buffering for a grid-resident block."""
    if use_single and hasattr(pl, "Buffered"):
        try:
            return pl.BlockSpec(block_shape, index_map, pipeline_mode=pl.Buffered(1))
        except TypeError:
            pass
    return pl.BlockSpec(block_shape, index_map)


def _physical_vmem_bytes():
    try:
        info = pltpu.get_tpu_info()
        cap = getattr(info, "vmem_capacity_bytes", None)
        if cap:
            return int(cap)
    except Exception:
        pass
    return 64 << 20          # conservative default: v7x per-TensorCore VMEM


def _r8(v):
    return -(-v // 8) * 8


def _r128(v):
    return -(-v // 128) * 128


def _choose_tiles(C, H, W, isz_x, isz_w, isz_o, budget, have_single_buffer):
    """Pick (channel tile c_t, input-row tile rows_t) under a per-chip VMEM budget.

    Budgets use the real padded (8,128)-tiled VMEM footprint of each block and real
    itemsizes; the streamed x/out blocks are counted double-buffered, the resident
    folded weight/bias single-buffered when pl.Buffered(1) can be requested.
    """
    def need(c_t, rows_t):
        w_factor = 1 if (have_single_buffer and c_t == C) else 2
        x_b = 2 * C * _r8(rows_t) * _r128(W) * isz_x
        o_b = 2 * c_t * _r8(2 * rows_t) * _r128(2 * W) * isz_o
        w_b = w_factor * 4 * _r8(c_t) * _r128(C) * isz_w
        b_b = w_factor * _r8(c_t) * 128 * 4
        e_b = 2 * _r8(W) * _r128(2 * W) * 4           # in-kernel stretch matrices
        return x_b + o_b + w_b + b_b + e_b

    row_cands = [d for d in range(H, 0, -1) if H % d == 0 and (d % 8 == 0 or d == H)]
    ct_cands = [C] + [d for d in range(C - 1, 7, -1) if C % d == 0 and d % 8 == 0]
    for c_t in ct_cands:
        for rows_t in row_cands:
            if need(c_t, rows_t) <= budget:
                return c_t, rows_t, need(c_t, rows_t)
    c_t, rows_t = ct_cands[-1], row_cands[-1]
    return c_t, rows_t, need(c_t, rows_t)


# --------------------------------------------------------------------------------------
# Forward
# --------------------------------------------------------------------------------------
def unpatch(x, weight, bias, *, compute_dtype=jnp.bfloat16):
    """ConvTranspose2d(dim, dim, kernel_size=2, stride=2) forward.

    x:      (N, C, H, W)   NCHW (PyTorch convention)
    weight: (C, C, 2, 2)   (in_channels, out_channels, kH, kW)
    bias:   (C,)
    compute_dtype: MXU operand dtype (accumulation stays float32).  bfloat16 by
        default for native-rate MXU issue on v6e/v7x; pass None for exact f32.
    returns (N, C, 2H, 2W) in x.dtype
    """
    N, C, H, W = x.shape
    assert weight.shape == (C, C, 2, 2), weight.shape
    out_dtype = x.dtype
    cdtype = jnp.dtype(compute_dtype) if compute_dtype is not None else jnp.dtype(weight.dtype)

    # Fold the 4 taps into the weight's leading axis, k = 2*kh + kw, rows = c_out:
    #   wfold[k, co, ci] = weight[ci, co, kh, kw]          (tiny one-off op)
    wfold = jnp.transpose(weight, (2, 3, 1, 0)).reshape(4, C, C).astype(cdtype)
    b2 = bias.reshape(C, 1).astype(jnp.float32)

    isz_x = jnp.dtype(x.dtype).itemsize
    isz_w = jnp.dtype(cdtype).itemsize
    isz_o = jnp.dtype(out_dtype).itemsize

    phys_vmem = _physical_vmem_bytes()
    budget = max(min(3 * phys_vmem // 4, phys_vmem - (24 << 20)), 16 << 20)
    have_single = hasattr(pl, "Buffered")
    c_t, rows_t, vmem_need = _choose_tiles(C, H, W, isz_x, isz_w, isz_o,
                                           budget, have_single)

    # Keep >=4 independent tiles so both v7x TensorCores (and the grid pipeline) have
    # work; prefer splitting rows over leaving a core idle.
    def n_tiles(rt):
        return N * (C // c_t) * (H // rt)
    while (n_tiles(rows_t) < 4 and rows_t % 2 == 0
           and ((rows_t // 2) % 8 == 0 or rows_t // 2 == H)):
        rows_t //= 2

    num_cb = C // c_t
    num_rb = H // rows_t

    # Grid order: weight-resident (row axis innermost) unless re-reading x per channel
    # block would cost more HBM traffic than re-streaming the folded weight.
    x_total = N * C * H * W * isz_x
    w_total = 4 * C * C * isz_w
    rb_inner_cost = num_cb * x_total + N * w_total
    cb_inner_cost = x_total + N * num_rb * w_total
    use_single = have_single and num_cb == 1

    x_block = (None, C, rows_t, W)
    w_block = (4, c_t, C)
    b_block = (c_t, 1)
    o_block = (None, c_t, 2 * rows_t, 2 * W)

    if rb_inner_cost <= cb_inner_cost:
        grid = (N, num_cb, num_rb)
        x_spec = pl.BlockSpec(x_block, lambda n, cb, rb: (n, 0, rb, 0))
        w_spec = _maybe_single_buffered(w_block, lambda n, cb, rb: (0, cb, 0), use_single)
        b_spec = _maybe_single_buffered(b_block, lambda n, cb, rb: (cb, 0), use_single)
        o_spec = pl.BlockSpec(o_block, lambda n, cb, rb: (n, cb, rb, 0))
    else:
        grid = (N, num_rb, num_cb)
        x_spec = pl.BlockSpec(x_block, lambda n, rb, cb: (n, 0, rb, 0))
        w_spec = _maybe_single_buffered(w_block, lambda n, rb, cb: (0, cb, 0), use_single)
        b_spec = _maybe_single_buffered(b_block, lambda n, rb, cb: (cb, 0), use_single)
        o_spec = pl.BlockSpec(o_block, lambda n, rb, cb: (n, cb, rb, 0))

    vmem_limit = int(min(max(vmem_need + (8 << 20), 32 << 20), phys_vmem - (8 << 20)))

    cost = pl.CostEstimate(
        flops=int(8 * N * C * C * H * W             # 4 tap matmuls
                  + 16 * N * C * H * W * W),        # lane-stretch matmuls
        transcendentals=0,
        bytes_accessed=int(x_total + w_total + C * 4
                           + N * C * 4 * H * W * isz_o),
    )

    return pl.pallas_call(
        _unpatch_kernel,
        out_shape=jax.ShapeDtypeStruct((N, C, 2 * H, 2 * W), out_dtype),
        grid_spec=pltpu.PrefetchScalarGridSpec(
            num_scalar_prefetch=0,
            grid=grid,
            in_specs=[x_spec, w_spec, b_spec],
            out_specs=o_spec,
        ),
        compiler_params=pltpu.CompilerParams(
            dimension_semantics=("parallel", "parallel", "parallel"),
            vmem_limit_bytes=vmem_limit,
        ),
        cost_estimate=cost,
    )(x, wfold, b2)


# --------------------------------------------------------------------------------------
# Init + reference
# --------------------------------------------------------------------------------------
def init_params(dim, key, dtype=jnp.float32):
    """Matches the module's __init__ distributions (kaiming_normal_ weight, 1e-6 bias)."""
    kw_, kb_ = jax.random.split(key)
    fan_in = dim * 2 * 2
    std = math.sqrt(2.0) / math.sqrt(fan_in)
    weight = std * jax.random.normal(kw_, (dim, dim, 2, 2), dtype=dtype)
    bias = 1e-6 * jax.random.normal(kb_, (dim,), dtype=dtype)
    return weight, bias


def unpatch_reference(x, weight, bias):
    """out[n,co,2h+kh,2w+kw] = sum_ci x[n,ci,h,w]*W[ci,co,kh,kw] + b[co]."""
    N, C, H, W = x.shape
    y = jnp.einsum("nihw,iokl->nohkwl", x, weight,
                   precision=jax.lax.Precision.HIGHEST)
    y = y.reshape(N, C, 2 * H, 2 * W)
    return y + bias[None, :, None, None]


if __name__ == "__main__":
    key = jax.random.PRNGKey(0)
    k_x, k_p = jax.random.split(key)

    N, C, H, W = 2, 4, 16, 16            # dim = 4
    x = jax.random.normal(k_x, (N, C, H, W), dtype=jnp.float32)
    weight, bias = init_params(C, k_p)

    ref = unpatch_reference(x, weight, bias)

    # Exact-precision path (f32 MXU operands).
    out_f32 = jax.jit(partial(unpatch, compute_dtype=None))(x, weight, bias)
    out_f32 = jax.block_until_ready(out_f32)
    assert out_f32.shape == (N, C, 2 * H, 2 * W), out_f32.shape
    assert out_f32.dtype == x.dtype, out_f32.dtype
    err_f32 = float(jnp.max(jnp.abs(out_f32 - ref)))
    assert err_f32 < 1e-3, err_f32

    # Default path (bf16 MXU operands, f32 accumulation) -- bf16-level tolerance.
    out_bf16 = jax.jit(unpatch)(x, weight, bias)
    out_bf16 = jax.block_until_ready(out_bf16)
    assert out_bf16.shape == (N, C, 2 * H, 2 * W), out_bf16.shape
    err_bf16 = float(jnp.max(jnp.abs(out_bf16 - ref)))
    assert err_bf16 < 5e-2, err_bf16

    print("KERNEL_OK")
</pallas_src>

<mosaic_0001>
module attributes {stable_mosaic.version = 11 : i64} {
  func.func @_unpatch_kernel(%arg0: i32, %arg1: i32, %arg2: i32, %arg3: memref<1x4x8x16xf32, #tpu.memory_space<vmem>>, %arg4: memref<4x4x4xf32, #tpu.memory_space<vmem>>, %arg5: memref<4x1xf32, #tpu.memory_space<vmem>>, %arg6: memref<1x4x16x32xf32, #tpu.memory_space<vmem>>) attributes {dimension_semantics = [#tpu.dimension_semantics<parallel>, #tpu.dimension_semantics<parallel>, #tpu.dimension_semantics<parallel>], iteration_bounds = array<i64: 2, 1, 2>, scalar_prefetch = 0 : i64, scratch_operands = 0 : i64, tpu.core_type = #tpu.core_type<tc>, window_params = [{transform_indices = @transform_0, window_bounds = array<i64: 1, 4, 8, 16>}, {pipeline_mode = #tpu.pipeline_mode<synchronous>, transform_indices = @transform_1, window_bounds = array<i64: 4, 4, 4>}, {pipeline_mode = #tpu.pipeline_mode<synchronous>, transform_indices = @transform_2, window_bounds = array<i64: 4, 1>}, {transform_indices = @transform_3, window_bounds = array<i64: 1, 4, 16, 32>}]} {
    %0 = tpu.iota {dimensions = array<i32: 1>} : vector<16x32xi32>
    %1 = tpu.iota {dimensions = array<i32: 0>} : vector<16x32xi32>
    %c2_i32 = arith.constant 2 : i32
    %2 = vector.broadcast %c2_i32 : i32 to vector<16x32xi32>
    %3 = arith.muli %2, %1 : vector<16x32xi32>
    %4 = arith.cmpi eq, %0, %3 : vector<16x32xi32>
    %cst = arith.constant 1.000000e+00 : f32
    %cst_0 = arith.constant 0.000000e+00 : f32
    %5 = vector.broadcast %cst : f32 to vector<16x32xf32>
    %6 = vector.broadcast %cst_0 : f32 to vector<16x32xf32>
    %7 = arith.select %4, %5, %6 : vector<16x32xi1>, vector<16x32xf32>
    %c2_i32_1 = arith.constant 2 : i32
    %8 = vector.broadcast %c2_i32_1 : i32 to vector<16x32xi32>
    %9 = arith.muli %8, %1 : vector<16x32xi32>
    %c1_i32 = arith.constant 1 : i32
    %10 = vector.broadcast %c1_i32 : i32 to vector<16x32xi32>
    %11 = arith.addi %9, %10 : vector<16x32xi32>
    %12 = arith.cmpi eq, %0, %11 : vector<16x32xi32>
    %cst_2 = arith.constant 1.000000e+00 : f32
    %cst_3 = arith.constant 0.000000e+00 : f32
    %13 = vector.broadcast %cst_2 : f32 to vector<16x32xf32>
    %14 = vector.broadcast %cst_3 : f32 to vector<16x32xf32>
    %15 = arith.select %12, %13, %14 : vector<16x32xi1>, vector<16x32xf32>
    %c0 = arith.constant 0 : index
    %c0_4 = arith.constant 0 : index
    %c0_5 = arith.constant 0 : index
    %16 = vector.load %arg4[%c0, %c0_4, %c0_5] : memref<4x4x4xf32, #tpu.memory_space<vmem>>, vector<1x4x4xf32>
    %17 = vector.shape_cast %16 : vector<1x4x4xf32> to vector<4x4xf32>
    %c1 = arith.constant 1 : index
    %c0_6 = arith.constant 0 : index
    %c0_7 = arith.constant 0 : index
    %18 = vector.load %arg4[%c1, %c0_6, %c0_7] : memref<4x4x4xf32, #tpu.memory_space<vmem>>, vector<1x4x4xf32>
    %19 = vector.shape_cast %18 : vector<1x4x4xf32> to vector<4x4xf32>
    %c2 = arith.constant 2 : index
    %c0_8 = arith.constant 0 : index
    %c0_9 = arith.constant 0 : index
    %20 = vector.load %arg4[%c2, %c0_8, %c0_9] : memref<4x4x4xf32, #tpu.memory_space<vmem>>, vector<1x4x4xf32>
    %21 = vector.shape_cast %20 : vector<1x4x4xf32> to vector<4x4xf32>
    %c3 = arith.constant 3 : index
    %c0_10 = arith.constant 0 : index
    %c0_11 = arith.constant 0 : index
    %22 = vector.load %arg4[%c3, %c0_10, %c0_11] : memref<4x4x4xf32, #tpu.memory_space<vmem>>, vector<1x4x4xf32>
    %23 = vector.shape_cast %22 : vector<1x4x4xf32> to vector<4x4xf32>
    %c0_12 = arith.constant 0 : index
    %c0_13 = arith.constant 0 : index
    %24 = vector.load %arg5[%c0_12, %c0_13] : memref<4x1xf32, #tpu.memory_space<vmem>>, vector<4x1xf32>
    %c0_i32 = arith.constant 0 : i32
    %c8_i32 = arith.constant 8 : i32
    %25 = arith.addi %c0_i32, %c8_i32 : i32
    %c1_i32_14 = arith.constant 1 : i32
    scf.for %arg7 = %c0_i32 to %25 step %c1_i32_14  : i32 {
      %c0_16 = arith.constant 0 : index
      %c0_17 = arith.constant 0 : index
      %26 = arith.index_cast %arg7 : i32 to index
      %c0_18 = arith.constant 0 : index
      %27 = vector.load %arg3[%c0_16, %c0_17, %26, %c0_18] : memref<1x4x8x16xf32, #tpu.memory_space<vmem>>, vector<1x4x1x16xf32>
      %28 = vector.shape_cast %27 : vector<1x4x1x16xf32> to vector<4x16xf32>
      %cst_19 = arith.constant dense<0.000000e+00> : vector<4x16xf32>
      %29 = tpu.matmul %17, %28, %cst_19 {dimension_numbers = #tpu.dot_dimension_numbers<[1], [0], [0], [1], [0, 0, 1, 1], [], []>} : vector<4x4xf32>, vector<4x16xf32>, vector<4x16xf32> -> vector<4x16xf32>
      %cst_20 = arith.constant dense<0.000000e+00> : vector<4x16xf32>
      %30 = tpu.matmul %19, %28, %cst_20 {dimension_numbers = #tpu.dot_dimension_numbers<[1], [0], [0], [1], [0, 0, 1, 1], [], []>} : vector<4x4xf32>, vector<4x16xf32>, vector<4x16xf32> -> vector<4x16xf32>
      %cst_21 = arith.constant dense<0.000000e+00> : vector<4x32xf32>
      %31 = tpu.matmul %29, %7, %cst_21 {dimension_numbers = #tpu.dot_dimension_numbers<[1], [0], [0], [1], [0, 0, 1, 1], [], []>} : vector<4x16xf32>, vector<16x32xf32>, vector<4x32xf32> -> vector<4x32xf32>
      %cst_22 = arith.constant dense<0.000000e+00> : vector<4x32xf32>
      %32 = tpu.matmul %30, %15, %cst_22 {dimension_numbers = #tpu.dot_dimension_numbers<[1], [0], [0], [1], [0, 0, 1, 1], [], []>} : vector<4x16xf32>, vector<16x32xf32>, vector<4x32xf32> -> vector<4x32xf32>
      %33 = arith.addf %31, %32 : vector<4x32xf32>
      %34 = vector.broadcast %24 : vector<4x1xf32> to vector<4x32xf32>
      %35 = arith.addf %33, %34 : vector<4x32xf32>
      %c2_i32_23 = arith.constant 2 : i32
      %36 = arith.muli %c2_i32_23, %arg7 : i32
      %c0_i32_24 = arith.constant 0 : i32
      %37 = arith.addi %36, %c0_i32_24 : i32
      %c0_25 = arith.constant 0 : index
      %c0_26 = arith.constant 0 : index
      %38 = arith.index_cast %37 : i32 to index
      %c0_27 = arith.constant 0 : index
      %39 = vector.load %arg6[%c0_25, %c0_26, %38, %c0_27] : memref<1x4x16x32xf32, #tpu.memory_space<vmem>>, vector<1x4x1x32xf32>
      %40 = vector.shape_cast %39 : vector<1x4x1x32xf32> to vector<4x32xf32>
      %41 = vector.shape_cast %35 : vector<4x32xf32> to vector<1x4x1x32xf32>
      tpu.vector_store %arg6[%c0_25, %c0_26, %38, %c0_27], %41 {strides = array<i32>} : memref<1x4x16x32xf32, #tpu.memory_space<vmem>>, vector<1x4x1x32xf32>,
      %cst_28 = arith.constant dense<0.000000e+00> : vector<4x16xf32>
      %42 = tpu.matmul %21, %28, %cst_28 {dimension_numbers = #tpu.dot_dimension_numbers<[1], [0], [0], [1], [0, 0, 1, 1], [], []>} : vector<4x4xf32>, vector<4x16xf32>, vector<4x16xf32> -> vector<4x16xf32>
      %cst_29 = arith.constant dense<0.000000e+00> : vector<4x16xf32>
      %43 = tpu.matmul %23, %28, %cst_29 {dimension_numbers = #tpu.dot_dimension_numbers<[1], [0], [0], [1], [0, 0, 1, 1], [], []>} : vector<4x4xf32>, vector<4x16xf32>, vector<4x16xf32> -> vector<4x16xf32>
      %cst_30 = arith.constant dense<0.000000e+00> : vector<4x32xf32>
      %44 = tpu.matmul %42, %7, %cst_30 {dimension_numbers = #tpu.dot_dimension_numbers<[1], [0], [0], [1], [0, 0, 1, 1], [], []>} : vector<4x16xf32>, vector<16x32xf32>, vector<4x32xf32> -> vector<4x32xf32>
      %cst_31 = arith.constant dense<0.000000e+00> : vector<4x32xf32>
      %45 = tpu.matmul %43, %15, %cst_31 {dimension_numbers = #tpu.dot_dimension_numbers<[1], [0], [0], [1], [0, 0, 1, 1], [], []>} : vector<4x16xf32>, vector<16x32xf32>, vector<4x32xf32> -> vector<4x32xf32>
      %46 = arith.addf %44, %45 : vector<4x32xf32>
      %47 = vector.broadcast %24 : vector<4x1xf32> to vector<4x32xf32>
      %48 = arith.addf %46, %47 : vector<4x32xf32>
      %c2_i32_32 = arith.constant 2 : i32
      %49 = arith.muli %c2_i32_32, %arg7 : i32
      %c1_i32_33 = arith.constant 1 : i32
      %50 = arith.addi %49, %c1_i32_33 : i32
      %c0_34 = arith.constant 0 : index
      %c0_35 = arith.constant 0 : index
      %51 = arith.index_cast %50 : i32 to index
      %c0_36 = arith.constant 0 : index
      %52 = vector.load %arg6[%c0_34, %c0_35, %51, %c0_36] : memref<1x4x16x32xf32, #tpu.memory_space<vmem>>, vector<1x4x1x32xf32>
      %53 = vector.shape_cast %52 : vector<1x4x1x32xf32> to vector<4x32xf32>
      %54 = vector.shape_cast %48 : vector<4x32xf32> to vector<1x4x1x32xf32>
      tpu.vector_store %arg6[%c0_34, %c0_35, %51, %c0_36], %54 {strides = array<i32>} : memref<1x4x16x32xf32, #tpu.memory_space<vmem>>, vector<1x4x1x32xf32>,
    }
    %c8_i32_15 = arith.constant 8 : i32
    return
  }
  func.func @transform_0(%arg0: i32, %arg1: i32, %arg2: i32) -> (i32, i32, i32, i32) {
    %c0_i32 = arith.constant 0 : i32
    %c0_i32_0 = arith.constant 0 : i32
    %c0_i32_1 = arith.constant 0 : i32
    return %arg0, %c0_i32, %arg2, %c0_i32_0 : i32, i32, i32, i32
  }
  func.func @transform_1(%arg0: i32, %arg1: i32, %arg2: i32) -> (i32, i32, i32) {
    %c0_i32 = arith.constant 0 : i32
    %c0_i32_0 = arith.constant 0 : i32
    %c0_i32_1 = arith.constant 0 : i32
    return %c0_i32, %arg1, %c0_i32_0 : i32, i32, i32
  }
  func.func @transform_2(%arg0: i32, %arg1: i32, %arg2: i32) -> (i32, i32) {
    %c0_i32 = arith.constant 0 : i32
    %c0_i32_0 = arith.constant 0 : i32
    return %arg1, %c0_i32 : i32, i32
  }
  func.func @transform_3(%arg0: i32, %arg1: i32, %arg2: i32) -> (i32, i32, i32, i32) {
    %c0_i32 = arith.constant 0 : i32
    %c0_i32_0 = arith.constant 0 : i32
    return %arg0, %arg1, %arg2, %c0_i32 : i32, i32, i32, i32
  }
}

</mosaic_0001>

<bundles_post_ra>
// kernel: unpatch.1
= control target key start
LH: loop header
LB: loop body
LE: loop exit
PB: predicated region body
PF: predicated region fallthrough
CT: control target
= control target key end

     0   :  { %8 = vsyncpa [#allocation3], 0  ;;  %s1806_s0 = inlined_call_operand.hbm [shape: f32[2,4,16,16], index: 0, kind: input, shape index: {}]   ;;  %s1807_s1 = inlined_call_operand.vmem [shape: f32[4,4,4], index: 1, kind: input, shape index: {}]   ;;  %s1808_s2 = inlined_call_operand.vmem [shape: f32[4,1], index: 2, kind: input, shape index: {}]   ;;  %s1809_s3 = inlined_call_operand.hbm [shape: f32[2,4,32,32], index: 3, kind: output, shape index: {}]  }
   0x1   :  { %10 = vsyncpa [#allocation3 + $0x1], 0 }
   0x2   :  { %11 = vsyncpa [#allocation4], 0 }
   0x3   :  { %13 = vsyncpa [#allocation4 + $0x1], 0  ;;  %s1511_s12 = smov 0   ;;  %s1513_s13 = smov 0  }
   0x4   :  { %s1515_s14 = smov 0   ;;  %s1517_s15 = smov 0  }
   0x5   :  { %s1519_s16 = smov 0   ;;  %s1521_s17 = smov 0  }
   0x6   :  { %s1523_s18 = smov 0   ;;  %s1525_s19 = smov 0  }
   0x7 LB: > { %s1144_s20 = sadd.s32 4294967295, %s1469_s19   ;;  %s1145_s21 = sadd.s32 4294967294, %s1469_s19   ;;  %s1469_s19 = sphi %s1525_s19, %s19_s19   ;;  %s1465_s18 = sphi %s1523_s18, %s1831_s18   ;;  %s1461_s17 = sphi %s1521_s17, %s1830_s17   ;;  %s1457_s16 = sphi %s1519_s16, %s1829_s16   ;;  %s1453_s15 = sphi %s1517_s15, %s1828_s15   ;;  %s1449_s14 = sphi %s1515_s14, %s1827_s14   ;;  %s1445_s13 = sphi %s1513_s13, %s1826_s13   ;;  %s1441_s12 = sphi %s1511_s12, %s1825_s12  }
   0x8   : > { %s31_s22 = sadd.s32 1, %s1461_s17  ;;  %s38_s23 = sadd.s32 1, %s1465_s18 }
   0x9   : > { %p32_p0 = scmp.ge.s32.totalorder %s31_s22, 2  ;;  %s47_s24 = sadd.s32 1, %s1449_s14 }
   0xa   : > { %p54_p1 = scmp.ne.s32.totalorder %s1449_s14, %s1445_s13  ;;  %p55_p2 = scmp.eq.s32.totalorder %s1469_s19, 0 }
   0xb   : > { %s1833_s22 = smov (%p32_p0, %s31_s22), 0  ;;  %s1835_s23 = smov (!%p32_p0, %s38_s23), %s1465_s18 }
   0xc   : > { %1812 = sst [smem:[#allocation10_spill]] %s1833_s22  ;;  %s43_s25 = ssub.s32 %s1461_s17, %s1833_s22 }
   0xd   : > { %p1564_p3 = por %p55_p2, %p54_p1  ;;  %p40_p4 = scmp.ge.s32.totalorder %s1835_s23, 2 }
   0xe   : > { %p60_p5 = scmp.ne.s32.totalorder %s1445_s13, %s1441_s12  ;;  %p61_p6 = scmp.eq.s32.totalorder %s1144_s20, 0 }
   0xf   : > { %p140_p7 = scmp.eq.s32.totalorder %s1144_s20, 3  ;;  %s1837_s23 = smov (%p40_p4, %s1835_s23), 0 }
  0x10   : > { %1814 = sst [smem:[#allocation11_spill]] %s1837_s23  ;;  %p1572_p8 = por %p61_p6, %p60_p5 }
  0x11   : > { %p1576_p9 = por %p140_p7, %p54_p1  ;;  %s42_s29 = ssub.s32 %s1465_s18, %s1837_s23 }
  0x12   : > { %p146_p10 = scmp.eq.s32.totalorder %s1145_s21, 3  ;;  %s44_s30 = sor.u32 %s43_s25, %s42_s29 }
  0x13   : > { %p45_p11 = scmp.eq.s32.totalorder %s44_s30, 0  ;;  %p1277_p13 = scmp.lt.s32.totalorder %s1469_s19, 4 }
  0x14   : > { %p1582_p12 = por %p146_p10, %p60_p5  ;;  %s180_s5 = sand.u32 1, %s1449_s14  }
  0x15   : > { %s1589_s6 = scalar_select %p45_p11, %s1449_s14, %s47_s24  }
  0x16   : > { %s1150_s7 = sshll.u32 %s180_s5, 5  ;;  %s1151_s8 = sshll.u32 %s1465_s18, 3 }
  0x17   : > { %s189_s9 = sadd.s32 %s1461_s17, %s1151_s8  ;;  %s184_s10 = scalar_lea.vmem [#allocation2], %s1150_s7 }
  0x18   : > { %s192_s11 = sshll.u32 %s184_s10, 4  ;;  %s1152_s20 = sshll.u32 %s189_s9, 7  ;;  %s193_s11 = int_to_ptr.vmem [resolvable:$true] %s192_s11 }
  0x19   : > { %s191_s21 = scalar_lea.hbm %s1806_s0, %s1152_s20  ;;  %p1598_p0 = pnand %p1277_p13, %p1564_p3 }
  0x1a   : > { %s181_s29 = scalar_lea.sflag [#allocation3], %s180_s5  ;;  %s1380_s24 = scalar_lea.vmem %s193_s11, 512 }
  0x1b   : > { %p1369_p1 = pneg %p1598_p0  ;;  %p1381_p2 = scmp.ne.s32.totalorder %s193_s11, %s1380_s24 }
  0x1c   : > { %s1475_s30 = smov [#allocation2]  }
  0x1d   : > { %p1383_p4 = pnand %p1381_p2, %p1369_p1  ;;  %s1385_s7 = sshll.u32 %s1475_s30, 4  ;;  %s1386_s7 = int_to_ptr.vmem [resolvable:$false] %s1385_s7 }
  0x1e   : > { %s1387_s8 = scalar_lea.vmem %s1386_s7, 1024  ;;  %p1388_p6 = scmp.lt.s32.totalorder %s193_s11, %s1386_s7 }
  0x1f   : > { %p1384_p5 = pneg %p1383_p4  ;;  %p1389_p7 = scmp.lt.s32.totalorder %s1387_s8, %s1380_s24 }
  0x21   : > { %p1390_p10 = por %p1389_p7, %p1388_p6 }
  0x23   : > { %p1391_p11 = pnand %p1390_p10, %p1384_p5 }
  0x25   : > { %1394 = shalt.err (!%p1391_p11)
}
  0x26   : > { %s1476_s22 = smov 256   ;;  %s1477_s23 = smov 128  }
  0x27   : > { %s1478_s26 = smov 8   ;;  %p1153_p3 = scmp.ge.s32.totalorder %s1469_s19, 1 }
  0x28   : > { %1272 = dma.hbm_to_vmem [thread:$0]  (!%p1598_p0), %s191_s21, 512, %s193_s11, %s181_s29, %s1476_s22, %s1477_s23, %s1478_s26  }
  0x29   : > { %p200_p13 = scmp.lt.s32.totalorder %s1469_s19, 5 }
  0x2b   : > { %p201_p1 = pnand %p1153_p3, %p200_p13 }
  0x2c   : > { %s1609_s5 = sand.u32 (!%p201_p1), 1, %s1445_s13  }
  0x2d   : > { %204 = sbr.rel (%p201_p1) target bundleno = 677 (0x2a5), region = 32  ;;  %s1154_s9 = sshll.u32 (!%p201_p1), %s1609_s5, 5 }
  0x2e   : > { %s207_s10 = scalar_lea.sflag (!%p201_p1), [#allocation3], %s1609_s5  ;;  %s1613_s20 = scalar_lea.vmem (!%p201_p1), [#allocation2], %s1154_s9 }
  0x32   : > { %1432 = dma.done.wait (%p1572_p8), %s207_s10, 512  }
  0x33   : > { %1434 = vsyncadd (%p1572_p8), %s207_s10, 4294966784  ;;  %s1155_s11 = sshll.u32 %s1609_s5, 6  ;;  %v251_v0 = vlaneseq  ;;  %v1636_v8 = vld [vmem:[%s1807_s1] sm:$0xf]  ;;  %v1641_v9 = vld [vmem:[%s1807_s1 + $0x4] sm:$0xf] }
  0x34   : > { %v1646_v10 = vld [vmem:[%s1807_s1 + $0x8] sm:$0xf]  ;;  %v1651_v11 = vld [vmem:[%s1807_s1 + $0xc] sm:$0xf]  ;;  %v1656_v12 = vld [vmem:[%s1808_s2] sm:$0xf] }
  0x35   : > { %v1620_v1 = vand.u32 127, %v251_v0  ;;  %v1622_v2 = vshrl.u32 %v251_v0, 7  ;;  %s1669_s26 = scalar_lea.vmem [#allocation5], %s1155_s11  ;;  %s1671_s9 = smov 0  }
  0x37   : > { %v255_v3 = vadd.s32 8, %v1622_v2  ;;  %v256_v4 = vmul.u32 2, %v1622_v2 }
  0x39   : > { %v257_v5 = vmul.u32 2, %v255_v3  ;;  %vm1627_vm0 = vcmp.eq.s32.totalorder %v1620_v1, %v256_v4  ;;  %v1631_v7 = vadd.s32 1, %v256_v4 }
  0x3b   : > { %vm1659_vm1 = vcmp.eq.s32.totalorder %v1620_v1, %v257_v5  ;;  %v1663_v14 = vadd.s32 1, %v257_v5  ;;  %vm264_vm2 = vcmp.eq.s32.totalorder %v1620_v1, %v1631_v7 }
  0x3d   : > { %vm265_vm3 = vcmp.eq.s32.totalorder %v1620_v1, %v1663_v14 }
  0x3e LB: >> { %v1479_v15 = vmov 0.0   ;;  %s282_s10 = scalar_lea.vmem %s1613_s20, %s1473_s9 [#allocation2]  ;;  %vm292_vm4 = vcmask 1041409   ;;  %vm1480_vm5 = vmmov 0   ;;  %vm295_vm6 = vcmask 1042434   ;;  %s1169_s11 = sshll.u32 %s1473_s9, 1  ;;  %s1473_s9 = sphi %s1671_s9, %s281_s9  }
  0x3f   : >> { %1211 = vmatprep.subr.mxu0 %v1479_v15  ;;  %1216 = vmatprep.subr.mxu1 %v1479_v15  ;;  %v283_v16 = vld [vmem:[%s282_s10] sm:$0x1]  ;;  %v284_v17 = vld [vmem:[%s282_s10 + $0x8] sm:$0x1]  ;;  %v285_v18 = vld [vmem:[%s282_s10 + $0x10] sm:$0x1]  ;;  %s633_s27 = scalar_lea.vmem %s1669_s26, %s1169_s11 [#allocation5] }
  0x40   : >> { %1213 = vmatprep.mubr.msk.f32.mxu0 %vm1480_vm5, %v1479_v15  ;;  %1218 = vmatprep.mubr.msk.f32.mxu1 %vm1480_vm5, %v1479_v15  ;;  %v286_v19 = vld [vmem:[%s282_s10 + $0x18] sm:$0x1]  ;;  %v291_v20 = vrot.slane %v284_v17, 7  ;;  %v294_v21 = vrot.slane %v285_v18, 6  ;;  %vm298_vm7 = vcmask 1043459   ;;  %vm304_vm8 = vcmask 1043456  }
  0x41   : >> { %v297_v22 = vrot.slane %v286_v19, 5  ;;  %vm300_vm9 = vcmask 31744   ;;  %v1481_v26 = vmov 1.0   ;;  %v1482_v27 = vmov 0   ;;  %s281_s9 = sadd.s32 1, %s1473_s9  }
  0x42   : >> { %v293_v23 = vsel %vm292_vm4, %v291_v20, %v283_v16  ;;  %1366 = vset.pattern.permute.xlu0 %v1482_v27  ;;  %vm450_vm10 = vcmask 130048   ;;  %v1483_v32 = vmov 1966171168   ;;  %vm634_vm11 = vcmask 253952   ;;  %p278_p8 = scmp.ge.s32.totalorder %s281_s9, 8  }
  0x43   : >> { %v296_v24 = vsel %vm295_vm6, %v294_v21, %v293_v23  ;;  %599 = vperm.xlu0 %1366, %v1656_v12   ;;  %v606_v33 = vunpack.c.l.s4 %v1483_v32  ;;  %s968_s21 = scalar_lea.sflag (%p278_p8), [#allocation4], %s1609_s5 }
  0x44   : >> { %v299_v25 = vsel %vm298_vm7, %v297_v22, %v296_v24 }
  0x45   : >> { %1212 = vmatpush3.msk.msra.mxu0 %vm304_vm8, %v299_v25  ;;  %1217 = vmatpush3.msk.msra.mxu1 %vm304_vm8, %v299_v25  ;;  %v607_v34 = vunpack.c.0.s8 %v606_v33 }
  0x46   : >> { %1214 = vmatmul.mubr.msk.f32.vlgmr.msra.gmra.mxu0 %vm300_vm9, %v1636_v8  ;;  %1219 = vmatmul.mubr.msk.f32.vlgmr.msra.gmra.mxu1 %vm300_vm9, %v1641_v9 }
  0x47   : >> { %1221 = vmatprep.subr.mxu0 %v1479_v15  ;;  %1228 = vmatprep.subr.mxu1 %v1479_v15  ;;  %v610_v39 = vsub.s32 %v607_v34, %v1622_v2 }
  0x48   : >> { %1222 = vmatpush3.msk.msra.mxu0 %vm265_vm3, %v1481_v26  ;;  %1229 = vmatpush3.msk.msra.mxu1 %vm1659_vm1, %v1481_v26 }
  0x49   : >> { %1223 = vmatprep.subr.mxu0 %v1479_v15  ;;  %1230 = vmatprep.subr.mxu1 %v1479_v15 }
  0x4a   : >> { %1224 = vmatpush3.msk.msra.mxu0 %vm264_vm2, %v1481_v26  ;;  %1231 = vmatpush3.msk.msra.mxu1 %vm1627_vm0, %v1481_v26 }
  0x4b   : >> { %1225 = vmatprep.mubr.msk.f32.mxu0 %vm1480_vm5, %v1479_v15  ;;  %1232 = vmatprep.mubr.msk.f32.mxu1 %vm1480_vm5, %v1479_v15 }
  0x4c   : >> { %1235 = vmatprep.subr.mxu0 %v1479_v15  ;;  %1240 = vmatprep.subr.mxu1 %v1479_v15 }
  0xbe   : >> { %v600_v35 = vpop.permute.xlu0 %599 }
 0x106   : >> { %v373_v28 = vpop.f32.mrf.mxu0  ;;  %v446_v29 = vpop.f32.mrf.mxu1 }
 0x107   : >> { %1226 = vmatmul.mubr.msk.f32.vlgmr.msra.gmra.mxu0 %vm450_vm10, %v446_v29  ;;  %1233 = vmatmul.mubr.msk.f32.vlgmr.msra.gmra.mxu1 %vm450_vm10, %v373_v28 }
 0x108   : >> { %1236 = vmatpush3.msk.msra.mxu0 %vm304_vm8, %v299_v25  ;;  %1241 = vmatpush3.msk.msra.mxu1 %vm304_vm8, %v299_v25  ;;  %v1215_v30 = vpop.f32.mrf.mxu0  ;;  %v1220_v31 = vpop.f32.mrf.mxu1 }
 0x109   : >> { %1237 = vmatprep.mubr.msk.f32.mxu0 %vm1480_vm5, %v1479_v15  ;;  %1242 = vmatprep.mubr.msk.f32.mxu1 %vm1480_vm5, %v1479_v15 }
 0x10a   : >> { %1245 = vmatprep.subr.mxu0 %v1479_v15  ;;  %1252 = vmatprep.subr.mxu1 %v1479_v15 }
 0x10b   : >> { %1238 = vmatmul.mubr.msk.f32.vlgmr.msra.gmra.mxu0 %vm300_vm9, %v1646_v10  ;;  %1243 = vmatmul.mubr.msk.f32.vlgmr.msra.gmra.mxu1 %vm300_vm9, %v1651_v11 }
 0x10c   : >> { %1246 = vmatpush3.msk.msra.mxu0 %vm265_vm3, %v1481_v26  ;;  %1253 = vmatpush3.msk.msra.mxu1 %vm1659_vm1, %v1481_v26 }
 0x10d   : >> { %1247 = vmatprep.subr.mxu0 %v1479_v15  ;;  %1254 = vmatprep.subr.mxu1 %v1479_v15 }
 0x10e   : >> { %1248 = vmatpush3.msk.msra.mxu0 %vm264_vm2, %v1481_v26  ;;  %1255 = vmatpush3.msk.msra.mxu1 %vm1627_vm0, %v1481_v26 }
 0x10f   : >> { %1249 = vmatprep.mubr.msk.f32.mxu0 %vm1480_vm5, %v1479_v15  ;;  %1256 = vmatprep.mubr.msk.f32.mxu1 %vm1480_vm5, %v1479_v15 }
 0x1c7   : >> { %v520_v36 = vpop.f32.mrf.mxu0  ;;  %v593_v37 = vpop.f32.mrf.mxu1 }
 0x1c8   : >> { %v594_v38 = vadd.f32 %v593_v37, %v520_v36 }
 0x1c9   : >> { %v1227_v40 = vpop.f32.mrf.mxu0  ;;  %v1234_v41 = vpop.f32.mrf.mxu1 }
 0x1ca   : >> { %v602_v42 = vadd.f32 %v600_v35, %v594_v38 }
 0x1cb   : >> { %v708_v43 = vpop.f32.mrf.mxu0  ;;  %v781_v44 = vpop.f32.mrf.mxu1 }
 0x1cc   : >> { %v611_v45 = vrot.slane %v602_v42, %v610_v39  ;;  %1250 = vmatmul.mubr.msk.f32.vlgmr.msra.gmra.mxu0 %vm450_vm10, %v781_v44  ;;  %1257 = vmatmul.mubr.msk.f32.vlgmr.msra.gmra.mxu1 %vm450_vm10, %v708_v43 }
 0x1cd   : >> { %v1239_v46 = vpop.f32.mrf.mxu0  ;;  %v1244_v47 = vpop.f32.mrf.mxu1 }
 0x1ce   : >> { %v612_v48 = vcombine.high %v611_v45, %v611_v45  ;;  %v619_v49 = vrot.slane %v611_v45, %v610_v39 }
 0x1d0   : >> { %v626_v50 = vrot.slane %v612_v48, %v610_v39  ;;  %v627_v51 = vcombine.high %v619_v49, %v619_v49  ;;  %635 = vst.msk [vmem:[%s633_s27] sm:$0x1] %vm634_vm11, %v619_v49 }
 0x1d2   : >> { %v628_v52 = vcombine.high %v626_v50, %v626_v50  ;;  %636 = vst.msk [vmem:[%s633_s27 + $0x10] sm:$0x1] %vm634_vm11, %v626_v50  ;;  %637 = vst.msk [vmem:[%s633_s27 + $0x20] sm:$0x1] %vm634_vm11, %v627_v51 }
 0x1d4   : >> { %638 = vst.msk [vmem:[%s633_s27 + $0x30] sm:$0x1] %vm634_vm11, %v628_v52 }
 0x28c   : >> { %v854_v53 = vpop.f32.mrf.mxu0  ;;  %v927_v54 = vpop.f32.mrf.mxu1 }
 0x28d   : >> { %v928_v55 = vadd.f32 %v927_v54, %v854_v53 }
 0x28e   : >> { %v1251_v56 = vpop.f32.mrf.mxu0  ;;  %v1258_v57 = vpop.f32.mrf.mxu1 }
 0x28f   : >> { %v931_v58 = vadd.f32 %v928_v55, %v600_v35 }
 0x291   : >> { %v940_v59 = vrot.slane %v931_v58, %v610_v39 }
 0x293   : >> { %v941_v60 = vcombine.high %v940_v59, %v940_v59  ;;  %v948_v61 = vrot.slane %v940_v59, %v610_v39 }
 0x295   : >> { %v955_v62 = vrot.slane %v941_v60, %v610_v39  ;;  %v956_v63 = vcombine.high %v948_v61, %v948_v61  ;;  %1181 = vst.msk [vmem:[%s633_s27 + $0x1] sm:$0x1] %vm634_vm11, %v948_v61  ;;  %280 = sbr.rel (!%p278_p8) target bundleno = 62 (0x3e), region = 101 }
 0x297   : >> { %v957_v0 = vcombine.high %v955_v62, %v955_v62  ;;  %1182 = vst.msk [vmem:[%s633_s27 + $0x11] sm:$0x1] %vm634_vm11, %v955_v62  ;;  %1183 = vst.msk [vmem:[%s633_s27 + $0x21] sm:$0x1] %vm634_vm11, %v956_v63 }
 0x299   : >> { %1184 = vst.msk [vmem:[%s633_s27 + $0x31] sm:$0x1] %vm634_vm11, %v957_v0 }
 0x29a   : > { %s1186_s25 = sshll.u32 %s1453_s15, 1  ;;  %s1187_s29 = sshll.u32 %s1457_s16, 4 }
 0x29b   : > { %s983_s24 = sadd.s32 %s1187_s29, %s1186_s25  ;;  %s996_s30 = sshll.u32 %s1669_s26, 4  ;;  %s997_s30 = int_to_ptr.vmem [resolvable:$true] %s996_s30 }
 0x29c   : > { %s1188_s7 = sshll.u32 %s983_s24, 7  ;;  %s1484_s20 = smov 256  }
 0x29d   : > { %s985_s5 = scalar_lea.hbm %s1809_s3, %s1188_s7  ;;  %1261 = sst [smem:[#allocation7]] (%p1576_p9), %s1484_s20 }
 0x29e   : > { %s1485_s23 = smov 512   ;;  %s1486_s9 = smov 2  }
 0x29f   : > { %1262 = sst [smem:[#allocation7 + $0x1]] (%p1576_p9), %s1485_s23  ;;  %s1487_s15 = smov 128  }
 0x2a0   : > { %1263 = sst [smem:[#allocation7 + $0x2]] (%p1576_p9), %s1486_s9  ;;  %s1488_s16 = smov 8  }
 0x2a1   : > { %1264 = sst [smem:[#allocation7 + $0x3]] (%p1576_p9), %s1487_s15  ;;  %s1489_s26 = smov 131072  }
 0x2a2   : > { %1265 = sst [smem:[#allocation7 + $0x4]] (%p1576_p9), %s1487_s15  ;;  %s1490_s10 = smov 0  }
 0x2a3   : > { %1266 = sst [smem:[#allocation7 + $0x5]] (%p1576_p9), %s1488_s16 }
 0x2a4   : > { %1267 = dma.general (%p1576_p9), %s997_s30, 1024, %s985_s5, %s968_s21, %s1489_s26, [#allocation7], %s1490_s10, 0  }
 0x2a5 PF: > { %p1278_p0 = scmp.ge.s32.totalorder %s1469_s19, 2  ;;  %s1024_s11 = sand.u32 1, %s1441_s12  }
 0x2a6   : > { %s1025_s27 = scalar_lea.sflag [#allocation4], %s1024_s11 }
 0x2a7   : > { %p1274_p2 = pnand %p1278_p0, %p1582_p12 }
 0x2a9   : > { %p1275_p4 = pneg %p1274_p2 }
 0x2ab   : > { %1436 = dma.done.wait (%p1275_p4), %s1025_s27, 1024  }
 0x2ac   : > { %1438 = vsyncadd (%p1275_p4), %s1025_s27, 4294966272  ;;  %s19_s19 = sadd.s32 1, %s1469_s19   ;;  %s1823_s28 = sld [smem:[#allocation10_spill]] }
 0x2ad   : > { %p16_p5 = scmp.ge.s32.totalorder %s19_s19, 6   ;;  %s1824_s21 = sld [smem:[#allocation11_spill]] }
 0x2ae   : > { %s1825_s12 = smov %s1445_s13  ;;  %s1826_s13 = smov %s1449_s14 }
 0x2af   : > { %s1827_s14 = smov %s1589_s6  ;;  %s1828_s15 = smov %s1461_s17 }
 0x2b0   : > { %s1829_s16 = smov %s1465_s18  ;;  %18 = sbr.rel (!%p16_p5) target bundleno = 7 (0x7), region = 112 }
 0x2b2   : > { %s1830_s17 = smov %s1823_s28 }
 0x2b3   : > { %s1831_s18 = smov %s1824_s21 }
 0x2b5   :  { %1030 = vsyncpa [#allocation3], 1 }
 0x2b6   :  { %1032 = vsyncpa [#allocation3 + $0x1], 1 }
 0x2b7   :  { %1033 = vsyncpa [#allocation4], 1 }
 0x2b8   :  { %1035 = vsyncpa [#allocation4 + $0x1], 1 }

</bundles_post_ra>
